<compile_context>
chip_gen: v5e
topology: v5e:2x2
jax: 0.10.0
libtpu: 0.0.40
codegen_flags: <defaults>
</compile_context>

<pallas_src>
import jax
import jax.numpy as jnp
from jax.experimental import pallas as pl
from jax.experimental.pallas import tpu as pltpu

_LANE = 1024              # lane-dense last dim for the repack path
_TINY_BYTES = 256 * 1024  # below this, plain jnp.abs(a-b) beats any kernel launch


def _l1dist_kernel(a_ref, b_ref, o_ref):
    # Elementwise hot path: one VPU sub+abs pass over the current VMEM tile.
    o_ref[...] = jnp.abs(a_ref[...] - b_ref[...])


def _tile_params(dtype):
    """Returns (sublane_multiple, target_bytes_per_input_buffer, vmem_limit_bytes)."""
    itemsize = jnp.dtype(dtype).itemsize
    # Packed sublane count: 8 for f32, 16 for bf16, 32 for int8/fp8.
    sublane = max(8, 32 // itemsize)
    # Generation-aware tile sizing (conservative default == v7x-safe).
    try:
        vmem_cap = int(pltpu.get_tpu_info().vmem_capacity_bytes)
    except Exception:
        vmem_cap = 64 * 1024 * 1024
    if vmem_cap >= 128 * 1024 * 1024:
        # v5e / v6e: 8 MiB per input buffer -> 3 arrays x 2 buffers = 48 MiB.
        target_buf_bytes = 8 * 1024 * 1024
        vmem_limit = 64 * 1024 * 1024
    else:
        # v7x (64 MiB physical VMEM per TC): 4 MiB buffers -> 24 MiB working set.
        target_buf_bytes = 4 * 1024 * 1024
        vmem_limit = 32 * 1024 * 1024
    return sublane, target_buf_bytes, vmem_limit


def _pick_block_rows(rows_total, lanes, itemsize, sublane, target_buf_bytes):
    """Row-tile size: ~target_buf_bytes per input buffer, sublane-aligned, >=2 grid steps."""
    if rows_total <= sublane:
        # Tiny slab: single full-extent block (full array dim is exempt from the
        # 8-row divisibility rule).
        return rows_total
    block_rows = max(sublane,
                     (target_buf_bytes // (lanes * itemsize)) // sublane * sublane)
    # Don't allocate a block bigger than the (sublane-rounded) array.
    block_rows = min(block_rows, pl.cdiv(rows_total, sublane) * sublane)
    # Ensure at least 2 grid steps so v7x's 2 TensorCores both stream data
    # (no effect on single-TC v5e/v6e).
    if pl.cdiv(rows_total, block_rows) < 2:
        block_rows = max(sublane, pl.cdiv(pl.cdiv(rows_total, 2), sublane) * sublane)
    return block_rows


def _call_pallas_2d(a2, b2, block_rows, vmem_limit):
    rows, lanes = a2.shape
    n = rows * lanes
    itemsize = jnp.dtype(a2.dtype).itemsize
    grid = (pl.cdiv(rows, block_rows),)
    return pl.pallas_call(
        _l1dist_kernel,
        out_shape=jax.ShapeDtypeStruct((rows, lanes), a2.dtype),
        grid=grid,
        in_specs=[
            pl.BlockSpec((block_rows, lanes), lambda i: (i, 0)),
            pl.BlockSpec((block_rows, lanes), lambda i: (i, 0)),
        ],
        out_specs=pl.BlockSpec((block_rows, lanes), lambda i: (i, 0)),
        compiler_params=pltpu.CompilerParams(
            # Row tiles are independent -> shardable across v7x's 2 TensorCores.
            dimension_semantics=("parallel",),
            vmem_limit_bytes=vmem_limit,
        ),
        cost_estimate=pl.CostEstimate(
            flops=2 * n, transcendentals=0, bytes_accessed=3 * n * itemsize),
    )(a2, b2)


def l1_dist(input_embedding, validation_embedding, *, force_pallas=False):
    """Pallas TPU L1Dist: |input - validation| (same semantics as the nn.Module)."""
    assert input_embedding.shape == validation_embedding.shape
    assert input_embedding.dtype == validation_embedding.dtype
    orig_shape = input_embedding.shape
    dtype = input_embedding.dtype
    itemsize = jnp.dtype(dtype).itemsize

    n = 1
    for d in orig_shape:
        n *= d

    # Degenerate / tiny inputs: let XLA fuse it, the launch overhead would dominate.
    if n == 0 or (not force_pallas and n * itemsize < _TINY_BYTES):
        return jnp.abs(input_embedding - validation_embedding)

    sublane, target_buf_bytes, vmem_limit = _tile_params(dtype)

    # --- Fast path: collapsed 2-D view is already lane-dense (no copies). ---
    if len(orig_shape) >= 2 and orig_shape[-1] % 128 == 0:
        lanes = orig_shape[-1]
        rows_total = n // lanes
        if rows_total >= 1 and sublane * lanes * itemsize <= target_buf_bytes:
            block_rows = _pick_block_rows(rows_total, lanes, itemsize,
                                          sublane, target_buf_bytes)
            a2 = input_embedding.reshape(rows_total, lanes)   # view, no copy
            b2 = validation_embedding.reshape(rows_total, lanes)
            out = _call_pallas_2d(a2, b2, block_rows, vmem_limit)
            return out.reshape(orig_shape)

    # --- Repack path: flatten to lane-dense [rows, 1024] with minimal tail pad. ---
    rows_total = pl.cdiv(n, _LANE)
    padded = rows_total * _LANE
    a_flat = input_embedding.reshape(-1)
    b_flat = validation_embedding.reshape(-1)
    if padded != n:
        a_flat = jnp.pad(a_flat, (0, padded - n))
        b_flat = jnp.pad(b_flat, (0, padded - n))
    a2 = a_flat.reshape(rows_total, _LANE)
    b2 = b_flat.reshape(rows_total, _LANE)
    block_rows = _pick_block_rows(rows_total, _LANE, itemsize, sublane, target_buf_bytes)
    out = _call_pallas_2d(a2, b2, block_rows, vmem_limit)
    out = out.reshape(-1)
    if padded != n:
        out = out[:n]
    return out.reshape(orig_shape)


if __name__ == "__main__":
    key = jax.random.PRNGKey(0)
    k1, k2, k3, k4, k5, k6 = jax.random.split(key, 6)

    # Small Siamese-head embeddings: batch=2, hidden=256 (lane-dense fast path).
    x = jax.random.normal(k1, (2, 256), dtype=jnp.float32)
    y = jax.random.normal(k2, (2, 256), dtype=jnp.float32)
    result = l1_dist(x, y, force_pallas=True)  # force Pallas path on tiny input
    jax.block_until_ready(result)
    ref = jnp.abs(x - y)
    assert result.shape == ref.shape
    assert result.dtype == ref.dtype
    assert jnp.allclose(result, ref), "Pallas L1Dist mismatch vs reference (small)"

    # Multi-step grid on the lane-dense fast path (no repack copies).
    x2 = jax.random.normal(k3, (640, 1024), dtype=jnp.float32)
    y2 = jax.random.normal(k4, (640, 1024), dtype=jnp.float32)
    result2 = l1_dist(x2, y2)
    jax.block_until_ready(result2)
    ref2 = jnp.abs(x2 - y2)
    assert result2.shape == ref2.shape
    assert jnp.allclose(result2, ref2), "Pallas L1Dist mismatch vs reference (tiled)"

    # Non-lane-dense last dim exercises the repack (minimal tail pad) path.
    x3 = jax.random.normal(k5, (3, 7, 50), dtype=jnp.float32)
    y3 = jax.random.normal(k6, (3, 7, 50), dtype=jnp.float32)
    result3 = l1_dist(x3, y3, force_pallas=True)
    jax.block_until_ready(result3)
    ref3 = jnp.abs(x3 - y3)
    assert result3.shape == ref3.shape
    assert jnp.allclose(result3, ref3), "Pallas L1Dist mismatch vs reference (repack)"

    print("KERNEL_OK")
</pallas_src>

<mosaic_0001>
module attributes {stable_mosaic.version = 11 : i64} {
  func.func @_l1dist_kernel(%arg0: i32, %arg1: memref<2x256xf32, #tpu.memory_space<vmem>>, %arg2: memref<2x256xf32, #tpu.memory_space<vmem>>, %arg3: memref<2x256xf32, #tpu.memory_space<vmem>>) attributes {dimension_semantics = [#tpu.dimension_semantics<parallel>], iteration_bounds = array<i64: 1>, scalar_prefetch = 0 : i64, scratch_operands = 0 : i64, tpu.core_type = #tpu.core_type<tc>, window_params = [{transform_indices = @transform_0, window_bounds = array<i64: 2, 256>}, {transform_indices = @transform_1, window_bounds = array<i64: 2, 256>}, {transform_indices = @transform_2, window_bounds = array<i64: 2, 256>}]} {
    %c0 = arith.constant 0 : index
    %c0_0 = arith.constant 0 : index
    %0 = vector.load %arg1[%c0, %c0_0] : memref<2x256xf32, #tpu.memory_space<vmem>>, vector<2x256xf32>
    %c0_1 = arith.constant 0 : index
    %c0_2 = arith.constant 0 : index
    %1 = vector.load %arg2[%c0_1, %c0_2] : memref<2x256xf32, #tpu.memory_space<vmem>>, vector<2x256xf32>
    %2 = arith.subf %0, %1 : vector<2x256xf32>
    %3 = math.absf %2 : vector<2x256xf32>
    %c0_3 = arith.constant 0 : index
    %c0_4 = arith.constant 0 : index
    %4 = vector.load %arg3[%c0_3, %c0_4] : memref<2x256xf32, #tpu.memory_space<vmem>>, vector<2x256xf32>
    tpu.vector_store %arg3[%c0_3, %c0_4], %3 {strides = array<i32>} : memref<2x256xf32, #tpu.memory_space<vmem>>, vector<2x256xf32>,
    return
  }
  func.func @transform_0(%arg0: i32) -> (i32, i32) {
    %c0_i32 = arith.constant 0 : i32
    %c0_i32_0 = arith.constant 0 : i32
    return %arg0, %c0_i32 : i32, i32
  }
  func.func @transform_1(%arg0: i32) -> (i32, i32) {
    %c0_i32 = arith.constant 0 : i32
    %c0_i32_0 = arith.constant 0 : i32
    return %arg0, %c0_i32 : i32, i32
  }
  func.func @transform_2(%arg0: i32) -> (i32, i32) {
    %c0_i32 = arith.constant 0 : i32
    %c0_i32_0 = arith.constant 0 : i32
    return %arg0, %c0_i32 : i32, i32
  }
}

</mosaic_0001>

<bundles_post_ra>
// kernel: tpu_custom_call.1
= control target key start
LH: loop header
LB: loop body
LE: loop exit
PB: predicated region body
PF: predicated region fallthrough
CT: control target
= control target key end

     0   :  { %7 = vsyncpa [#allocation3], 0  ;;  %s171_s0 = inlined_call_operand.hbm [shape: f32[2,256], index: 0, kind: input, shape index: {}]   ;;  %s172_s1 = inlined_call_operand.hbm [shape: f32[2,256], index: 1, kind: input, shape index: {}]   ;;  %s173_s2 = inlined_call_operand.hbm [shape: f32[2,256], index: 2, kind: output, shape index: {}]  }
   0x1   :  { %8 = vsyncpa [#allocation6], 0 }
   0x2   :  { %9 = vsyncpa [#allocation4], 0  ;;  %s15_s11 = sshll.u32 %s171_s0, 4  ;;  %s144_s12 = smov [#allocation2]   ;;  %s16_s11 = int_to_ptr.hbm [resolvable:$true] %s15_s11 }
   0x3   :  { %s17_s13 = sshll.u32 %s144_s12, 4  ;;  %s26_s16 = sshll.u32 %s172_s1, 4  ;;  %s18_s13 = int_to_ptr.vmem [resolvable:$true] %s17_s13  ;;  %s27_s16 = int_to_ptr.hbm [resolvable:$true] %s26_s16 }
   0x4   :  { %20 = dma.hbm_to_vmem [thread:$0]  %s16_s11, 64, %s18_s13, [#allocation3]  }
   0x5   :  { %s145_s17 = smov [#allocation5]  }
   0x6   :  { %s28_s18 = sshll.u32 %s145_s17, 4  ;;  %s29_s18 = int_to_ptr.vmem [resolvable:$true] %s28_s18 }
   0x7   :  { %31 = dma.hbm_to_vmem [thread:$0]  %s27_s16, 64, %s29_s18, [#allocation6]  }
   0x8   :  { %138 = dma.done.wait [#allocation3], 64  }
   0x9   :  { %139 = vsyncadd [#allocation3], 4294967232 }
   0xa   :  { %140 = dma.done.wait [#allocation6], 64  }
   0xb   :  { %141 = vsyncadd [#allocation6], 4294967232  ;;  %v40_v0 = vld [vmem:[#allocation2] sm:$0xf]  ;;  %v41_v1 = vld [vmem:[#allocation5] sm:$0xf] }
   0xc   :  { %s146_s0 = smov [#allocation7]   ;;  %s52_s22 = sshll.u32 %s173_s2, 4  ;;  %v42_v2 = vsub.f32 %v40_v0, %v41_v1  ;;  %s53_s22 = int_to_ptr.hbm [resolvable:$true] %s52_s22 }
   0xd   :  { %s50_s19 = sshll.u32 %s146_s0, 4  ;;  %s51_s19 = int_to_ptr.vmem [resolvable:$true] %s50_s19 }
   0xe   :  { %v43_v3 = vand.u32 2147483647, %v42_v2 }
  0x10   :  { %44 = vst [vmem:[#allocation7] sm:$0xf] %v43_v3 }
  0x11   :  { %55 = dma.vmem_to_hbm [thread:$0]  %s51_s19, 64, %s53_s22, [#allocation4]  }
  0x12   :  { %142 = dma.done.wait [#allocation4], 64  }
  0x13   :  { %143 = vsyncadd [#allocation4], 4294967232 }
  0x14   :  { %60 = vsyncpa [#allocation3], 1 }
  0x15   :  { %61 = vsyncpa [#allocation6], 1 }
  0x16   :  { %62 = vsyncpa [#allocation4], 1 }

</bundles_post_ra>
